<compile_context>
chip_gen: v5e
topology: v5e:2x2
jax: 0.10.0
libtpu: 0.0.40
codegen_flags: <defaults>
</compile_context>

<pallas_src>
import jax
import jax.numpy as jnp
from jax.experimental import pallas as pl
from jax.experimental.pallas import tpu as pltpu

H = W = 16      # spatial size
CIN = 4         # input channels
CC = 8          # conv output channels
HID = 32        # head hidden width
NCLS = 10       # head output width

HP = H + 2      # padded height
WP = W + 2      # padded width
SP = HP * WP    # padded spatial per sample (= 324), flat index = h*WP + w
KTAPS = 9 * CIN  # im2col contraction depth (3*3 taps x CIN = 36)


def _make_kernel(b_tile):
    L = b_tile * SP            # lane width of the input slab
    LY = L - 2 * WP - 2        # conv-output width (max tap shift = 2*WP + 2 = 38)
    LQ = LY - WP - 1           # pooled-output width (max pool shift = WP + 1 = 19)
    LM = LQ + WP               # horizontal pair-max width

    def kernel(x_ref, wc_ref, bc_ref, w1_ref, b1_ref, w2_ref, b2_ref, p_ref,
               out_ref, col_ref):
        # x_ref : (CIN, L) bf16   column = b_local*324 + h*18 + w (padded coords)
        # wc_ref: (CC, 36) bf16   column = (kh*3 + kw)*CIN + cin
        # bc_ref: (CC, 1)  w1_ref: (HID, CC)  b1_ref: (HID, 1)
        # w2_ref: (NCLS, HID)     b2_ref: (NCLS, 1)            (all f32)
        # p_ref : (LQ, b_tile) bf16  block-diagonal GAP selector (values 0, 1/64)
        # out   : (NCLS, b_tile) f32
        # col_ref: (36, LY) bf16  im2col staging scratch

        # im2col: stage the 9 shifted conv-tap slabs; tap t = kh*3 + kw lands at
        # sublane offset CIN*t (whole packed bf16 sublane rows per store).
        for kh in range(3):
            for kw in range(3):
                t = kh * 3 + kw
                s = kh * WP + kw
                col_ref[CIN * t:CIN * (t + 1), :] = x_ref[:, s:s + LY]

        # Conv2d(3x3, stride 1, 'same') as ONE MXU matmul (bf16 in, f32 acc),
        # then bias + ReLU.
        y = jnp.dot(wc_ref[...], col_ref[...],
                    preferred_element_type=jnp.float32)           # (CC, LY)
        y = jnp.maximum(y + bc_ref[...], 0.0)

        # MaxPool2d(2, 2), separable: horizontal pair-max then vertical pair-max.
        m1 = jnp.maximum(y[:, :LM], y[:, 1:LM + 1])               # (CC, LM)
        pm = jnp.maximum(m1[:, :LQ], m1[:, WP:WP + LQ])           # (CC, LQ)

        # AdaptiveAvgPool2d((1,1)) + flatten + per-sample segmentation, fused
        # into one matmul against the constant block-diagonal 1/64 selector.
        # Invalid/cross-sample columns are multiplied by exact zeros.
        feat = jnp.dot(pm.astype(jnp.bfloat16), p_ref[...],
                       preferred_element_type=jnp.float32)        # (CC, B)

        # head: Linear(CC->HID) -> ReLU -> Linear(HID->NCLS), transposed form.
        h1 = jnp.maximum(
            jnp.dot(w1_ref[...], feat, preferred_element_type=jnp.float32)
            + b1_ref[...], 0.0)                                   # (HID, B)
        out_ref[...] = (jnp.dot(w2_ref[...], h1,
                                preferred_element_type=jnp.float32)
                        + b2_ref[...])                            # (NCLS, B)

    return kernel, L, LY, LQ


def _const_spec(shape):
    # Constant-index-map operand: fetched once, single-buffered (no pipelining
    # benefit; halves its VMEM residency, which matters most on v7x's 64 MiB).
    return pl.BlockSpec(shape, lambda i: (0,) * len(shape),
                        pipeline_mode=pl.Buffered(1))


def cropnet_forward(x_nchw, params, b_tile=None):
    """x_nchw: (N, CIN, H, W) float32, PyTorch layout."""
    wc, bc, w1, b1, w2, b2 = params
    n = x_nchw.shape[0]
    if b_tile is None:
        # Up to 64 samples per tile (lane-dense slabs, amortized per-step
        # overhead), but always >= 2 grid steps so both v7x TensorCores get
        # work under dimension_semantics=("parallel",).
        half = -(-n // 2)
        b_tile = half if half < 8 else min(64, ((half + 7) // 8) * 8)
        b_tile = max(1, b_tile)
    nt = -(-n // b_tile)                       # number of grid steps
    n_pad = nt * b_tile

    kernel, L, LY, LQ = _make_kernel(b_tile)

    # Input slabs: (nt, CIN, b_tile*324) bf16, column = b_local*324 + h*18 + w.
    xp = jnp.pad(x_nchw.astype(jnp.float32),
                 ((0, n_pad - n), (0, 0), (1, 1), (1, 1)))        # (Np, CIN, 18, 18)
    xt = jnp.transpose(xp, (1, 0, 2, 3)).reshape(CIN, n_pad, SP)
    xt = xt.reshape(CIN, nt, b_tile * SP).transpose(1, 0, 2)      # (nt, CIN, L)
    xt = xt.astype(jnp.bfloat16)

    # Constant pooling/GAP selector: P[c, b] = 1/64 iff column c belongs to
    # sample b and is the top-left corner of a 2x2 maxpool window.
    # bf16 is exact here (values are 0 and 2^-6).
    c = jnp.arange(LQ)
    bi, sp = c // SP, c % SP
    hh, ww = sp // WP, sp % WP
    valid = (hh % 2 == 0) & (ww % 2 == 0) & (hh < H) & (ww < W)
    pool = jnp.where(
        valid[:, None] & (bi[:, None] == jnp.arange(b_tile)[None, :]),
        1.0 / float((H // 2) * (W // 2)), 0.0).astype(jnp.bfloat16)  # (LQ, B)

    # Weights in kernel layout (PyTorch layouts in).  Conv-weight columns match
    # the im2col scratch rows: col = (kh*3 + kw)*CIN + cin.
    wc_k = jnp.transpose(wc, (0, 2, 3, 1)).reshape(CC, KTAPS).astype(jnp.bfloat16)
    bc_k = bc.reshape(CC, 1).astype(jnp.float32)
    w1_k = w1.astype(jnp.float32)
    b1_k = b1.reshape(HID, 1).astype(jnp.float32)
    w2_k = w2.astype(jnp.float32)
    b2_k = b2.reshape(NCLS, 1).astype(jnp.float32)

    out = pl.pallas_call(
        kernel,
        out_shape=jax.ShapeDtypeStruct((nt, NCLS, b_tile), jnp.float32),
        grid_spec=pltpu.PrefetchScalarGridSpec(
            num_scalar_prefetch=0,
            grid=(nt,),
            in_specs=[
                pl.BlockSpec((None, CIN, L), lambda i: (i, 0, 0)),
                _const_spec((CC, KTAPS)),
                _const_spec((CC, 1)),
                _const_spec((HID, CC)),
                _const_spec((HID, 1)),
                _const_spec((NCLS, HID)),
                _const_spec((NCLS, 1)),
                _const_spec((LQ, b_tile)),
            ],
            out_specs=pl.BlockSpec((None, NCLS, b_tile), lambda i: (i, 0, 0)),
            scratch_shapes=[pltpu.VMEM((KTAPS, LY), jnp.bfloat16)],
        ),
        compiler_params=pltpu.CompilerParams(
            dimension_semantics=("parallel",),
            vmem_limit_bytes=32 * 1024 * 1024),
    )(xt, wc_k, bc_k, w1_k, b1_k, w2_k, b2_k, pool)

    out = jnp.transpose(out, (0, 2, 1)).reshape(n_pad, NCLS)[:n]
    return out


def init_params(key):
    """Parameters in PyTorch layouts: conv (O,I,kh,kw), linear (out,in)."""
    ks = jax.random.split(key, 6)
    wc = jax.random.normal(ks[0], (CC, CIN, 3, 3), jnp.float32) / jnp.sqrt(9.0 * CIN)
    bc = 0.01 * jax.random.normal(ks[1], (CC,), jnp.float32)
    w1 = jax.random.normal(ks[2], (HID, CC), jnp.float32) / jnp.sqrt(float(CC))
    b1 = 0.01 * jax.random.normal(ks[3], (HID,), jnp.float32)
    w2 = jax.random.normal(ks[4], (NCLS, HID), jnp.float32) / jnp.sqrt(float(HID))
    b2 = 0.01 * jax.random.normal(ks[5], (NCLS,), jnp.float32)
    return wc, bc, w1, b1, w2, b2


def reference_forward(x_nchw, params):
    """Pure-JAX reference matching the PyTorch forward semantics (f32 HIGHEST)."""
    wc, bc, w1, b1, w2, b2 = params
    x = x_nchw.astype(jnp.float32)
    y = jax.lax.conv_general_dilated(
        x, wc.astype(jnp.float32), window_strides=(1, 1),
        padding=((1, 1), (1, 1)),
        dimension_numbers=("NCHW", "OIHW", "NCHW"),
        precision=jax.lax.Precision.HIGHEST)
    y = jnp.maximum(y + bc[None, :, None, None], 0.0)                     # ReLU
    y = y.reshape(x.shape[0], CC, H // 2, 2, W // 2, 2).max(axis=(3, 5))  # MaxPool
    feat = y.mean(axis=(2, 3))                                            # GAP + flatten
    h1 = jnp.maximum(
        jnp.einsum("nc,hc->nh", feat, w1,
                   precision=jax.lax.Precision.HIGHEST) + b1, 0.0)
    return jnp.einsum("nh,oh->no", h1, w2,
                      precision=jax.lax.Precision.HIGHEST) + b2


if __name__ == "__main__":
    key = jax.random.PRNGKey(0)
    kx, kp = jax.random.split(key)
    params = init_params(kp)

    # Primary small example (batch=2 -> b_tile=1, 2 grid steps).
    x = jax.random.normal(kx, (2, CIN, H, W), jnp.float32)   # NCHW, like PyTorch
    out = jax.block_until_ready(cropnet_forward(x, params))
    ref = reference_forward(x, params)
    assert out.shape == (2, NCLS)
    # bf16 conv operands -> ~1e-3 relative error vs. the f32 HIGHEST reference.
    assert jnp.allclose(out, ref, rtol=1e-2, atol=1e-2), (out, ref)

    # Second shape exercising multi-sample tiles and batch padding (11 -> 2x6).
    x2 = jax.random.normal(jax.random.PRNGKey(1), (11, CIN, H, W), jnp.float32)
    out2 = jax.block_until_ready(cropnet_forward(x2, params))
    ref2 = reference_forward(x2, params)
    assert out2.shape == (11, NCLS)
    assert jnp.allclose(out2, ref2, rtol=1e-2, atol=1e-2), (out2, ref2)

    print("KERNEL_OK")
</pallas_src>

<mosaic_0001>
module attributes {stable_mosaic.version = 11 : i64} {
  func.func @kernel(%arg0: i32, %arg1: memref<1x4x324xbf16, #tpu.memory_space<vmem>>, %arg2: memref<8x36xbf16, #tpu.memory_space<vmem>>, %arg3: memref<8x1xf32, #tpu.memory_space<vmem>>, %arg4: memref<32x8xf32, #tpu.memory_space<vmem>>, %arg5: memref<32x1xf32, #tpu.memory_space<vmem>>, %arg6: memref<10x32xf32, #tpu.memory_space<vmem>>, %arg7: memref<10x1xf32, #tpu.memory_space<vmem>>, %arg8: memref<267x1xbf16, #tpu.memory_space<vmem>>, %arg9: memref<1x10x1xf32, #tpu.memory_space<vmem>>, %arg10: memref<36x286xbf16, #tpu.memory_space<vmem>>) attributes {dimension_semantics = [#tpu.dimension_semantics<parallel>], iteration_bounds = array<i64: 2>, scalar_prefetch = 0 : i64, scratch_operands = 1 : i64, tpu.core_type = #tpu.core_type<tc>, window_params = [{transform_indices = @transform_0, window_bounds = array<i64: 1, 4, 324>}, {pipeline_mode = #tpu.pipeline_mode<synchronous>, transform_indices = @transform_1, window_bounds = array<i64: 8, 36>}, {pipeline_mode = #tpu.pipeline_mode<synchronous>, transform_indices = @transform_2, window_bounds = array<i64: 8, 1>}, {pipeline_mode = #tpu.pipeline_mode<synchronous>, transform_indices = @transform_3, window_bounds = array<i64: 32, 8>}, {pipeline_mode = #tpu.pipeline_mode<synchronous>, transform_indices = @transform_4, window_bounds = array<i64: 32, 1>}, {pipeline_mode = #tpu.pipeline_mode<synchronous>, transform_indices = @transform_5, window_bounds = array<i64: 10, 32>}, {pipeline_mode = #tpu.pipeline_mode<synchronous>, transform_indices = @transform_6, window_bounds = array<i64: 10, 1>}, {pipeline_mode = #tpu.pipeline_mode<synchronous>, transform_indices = @transform_7, window_bounds = array<i64: 267, 1>}, {transform_indices = @transform_8, window_bounds = array<i64: 1, 10, 1>}]} {
    %c0 = arith.constant 0 : index
    %c0_0 = arith.constant 0 : index
    %c0_1 = arith.constant 0 : index
    %0 = vector.load %arg1[%c0, %c0_0, %c0_1] : memref<1x4x324xbf16, #tpu.memory_space<vmem>>, vector<1x4x286xbf16>
    %1 = vector.shape_cast %0 : vector<1x4x286xbf16> to vector<4x286xbf16>
    %c0_2 = arith.constant 0 : index
    %c0_3 = arith.constant 0 : index
    %2 = vector.load %arg10[%c0_2, %c0_3] : memref<36x286xbf16, #tpu.memory_space<vmem>>, vector<4x286xbf16>
    tpu.vector_store %arg10[%c0_2, %c0_3], %1 {strides = array<i32>} : memref<36x286xbf16, #tpu.memory_space<vmem>>, vector<4x286xbf16>,
    %c0_4 = arith.constant 0 : index
    %c0_5 = arith.constant 0 : index
    %c1 = arith.constant 1 : index
    %3 = vector.load %arg1[%c0_4, %c0_5, %c1] : memref<1x4x324xbf16, #tpu.memory_space<vmem>>, vector<1x4x286xbf16>
    %4 = vector.shape_cast %3 : vector<1x4x286xbf16> to vector<4x286xbf16>
    %c4 = arith.constant 4 : index
    %c0_6 = arith.constant 0 : index
    %5 = vector.load %arg10[%c4, %c0_6] : memref<36x286xbf16, #tpu.memory_space<vmem>>, vector<4x286xbf16>
    tpu.vector_store %arg10[%c4, %c0_6], %4 {strides = array<i32>} : memref<36x286xbf16, #tpu.memory_space<vmem>>, vector<4x286xbf16>,
    %c0_7 = arith.constant 0 : index
    %c0_8 = arith.constant 0 : index
    %c2 = arith.constant 2 : index
    %6 = vector.load %arg1[%c0_7, %c0_8, %c2] : memref<1x4x324xbf16, #tpu.memory_space<vmem>>, vector<1x4x286xbf16>
    %7 = vector.shape_cast %6 : vector<1x4x286xbf16> to vector<4x286xbf16>
    %c8 = arith.constant 8 : index
    %c0_9 = arith.constant 0 : index
    %8 = vector.load %arg10[%c8, %c0_9] : memref<36x286xbf16, #tpu.memory_space<vmem>>, vector<4x286xbf16>
    tpu.vector_store %arg10[%c8, %c0_9], %7 {strides = array<i32>} : memref<36x286xbf16, #tpu.memory_space<vmem>>, vector<4x286xbf16>,
    %c0_10 = arith.constant 0 : index
    %c0_11 = arith.constant 0 : index
    %c18 = arith.constant 18 : index
    %9 = vector.load %arg1[%c0_10, %c0_11, %c18] : memref<1x4x324xbf16, #tpu.memory_space<vmem>>, vector<1x4x286xbf16>
    %10 = vector.shape_cast %9 : vector<1x4x286xbf16> to vector<4x286xbf16>
    %c12 = arith.constant 12 : index
    %c0_12 = arith.constant 0 : index
    %11 = vector.load %arg10[%c12, %c0_12] : memref<36x286xbf16, #tpu.memory_space<vmem>>, vector<4x286xbf16>
    tpu.vector_store %arg10[%c12, %c0_12], %10 {strides = array<i32>} : memref<36x286xbf16, #tpu.memory_space<vmem>>, vector<4x286xbf16>,
    %c0_13 = arith.constant 0 : index
    %c0_14 = arith.constant 0 : index
    %c19 = arith.constant 19 : index
    %12 = vector.load %arg1[%c0_13, %c0_14, %c19] : memref<1x4x324xbf16, #tpu.memory_space<vmem>>, vector<1x4x286xbf16>
    %13 = vector.shape_cast %12 : vector<1x4x286xbf16> to vector<4x286xbf16>
    %c16 = arith.constant 16 : index
    %c0_15 = arith.constant 0 : index
    %14 = vector.load %arg10[%c16, %c0_15] : memref<36x286xbf16, #tpu.memory_space<vmem>>, vector<4x286xbf16>
    tpu.vector_store %arg10[%c16, %c0_15], %13 {strides = array<i32>} : memref<36x286xbf16, #tpu.memory_space<vmem>>, vector<4x286xbf16>,
    %c0_16 = arith.constant 0 : index
    %c0_17 = arith.constant 0 : index
    %c20 = arith.constant 20 : index
    %15 = vector.load %arg1[%c0_16, %c0_17, %c20] : memref<1x4x324xbf16, #tpu.memory_space<vmem>>, vector<1x4x286xbf16>
    %16 = vector.shape_cast %15 : vector<1x4x286xbf16> to vector<4x286xbf16>
    %c20_18 = arith.constant 20 : index
    %c0_19 = arith.constant 0 : index
    %17 = vector.load %arg10[%c20_18, %c0_19] : memref<36x286xbf16, #tpu.memory_space<vmem>>, vector<4x286xbf16>
    tpu.vector_store %arg10[%c20_18, %c0_19], %16 {strides = array<i32>} : memref<36x286xbf16, #tpu.memory_space<vmem>>, vector<4x286xbf16>,
    %c0_20 = arith.constant 0 : index
    %c0_21 = arith.constant 0 : index
    %c36 = arith.constant 36 : index
    %18 = vector.load %arg1[%c0_20, %c0_21, %c36] : memref<1x4x324xbf16, #tpu.memory_space<vmem>>, vector<1x4x286xbf16>
    %19 = vector.shape_cast %18 : vector<1x4x286xbf16> to vector<4x286xbf16>
    %c24 = arith.constant 24 : index
    %c0_22 = arith.constant 0 : index
    %20 = vector.load %arg10[%c24, %c0_22] : memref<36x286xbf16, #tpu.memory_space<vmem>>, vector<4x286xbf16>
    tpu.vector_store %arg10[%c24, %c0_22], %19 {strides = array<i32>} : memref<36x286xbf16, #tpu.memory_space<vmem>>, vector<4x286xbf16>,
    %c0_23 = arith.constant 0 : index
    %c0_24 = arith.constant 0 : index
    %c37 = arith.constant 37 : index
    %21 = vector.load %arg1[%c0_23, %c0_24, %c37] : memref<1x4x324xbf16, #tpu.memory_space<vmem>>, vector<1x4x286xbf16>
    %22 = vector.shape_cast %21 : vector<1x4x286xbf16> to vector<4x286xbf16>
    %c28 = arith.constant 28 : index
    %c0_25 = arith.constant 0 : index
    %23 = vector.load %arg10[%c28, %c0_25] : memref<36x286xbf16, #tpu.memory_space<vmem>>, vector<4x286xbf16>
    tpu.vector_store %arg10[%c28, %c0_25], %22 {strides = array<i32>} : memref<36x286xbf16, #tpu.memory_space<vmem>>, vector<4x286xbf16>,
    %c0_26 = arith.constant 0 : index
    %c0_27 = arith.constant 0 : index
    %c38 = arith.constant 38 : index
    %24 = vector.load %arg1[%c0_26, %c0_27, %c38] : memref<1x4x324xbf16, #tpu.memory_space<vmem>>, vector<1x4x286xbf16>
    %25 = vector.shape_cast %24 : vector<1x4x286xbf16> to vector<4x286xbf16>
    %c32 = arith.constant 32 : index
    %c0_28 = arith.constant 0 : index
    %26 = vector.load %arg10[%c32, %c0_28] : memref<36x286xbf16, #tpu.memory_space<vmem>>, vector<4x286xbf16>
    tpu.vector_store %arg10[%c32, %c0_28], %25 {strides = array<i32>} : memref<36x286xbf16, #tpu.memory_space<vmem>>, vector<4x286xbf16>,
    %c0_29 = arith.constant 0 : index
    %c0_30 = arith.constant 0 : index
    %27 = vector.load %arg2[%c0_29, %c0_30] : memref<8x36xbf16, #tpu.memory_space<vmem>>, vector<8x36xbf16>
    %c0_31 = arith.constant 0 : index
    %c0_32 = arith.constant 0 : index
    %28 = vector.load %arg10[%c0_31, %c0_32] : memref<36x286xbf16, #tpu.memory_space<vmem>>, vector<36x286xbf16>
    %cst = arith.constant dense<0.000000e+00> : vector<8x286xf32>
    %29 = tpu.matmul %27, %28, %cst {dimension_numbers = #tpu.dot_dimension_numbers<[1], [0], [0], [1], [0, 0, 1, 1], [], []>} : vector<8x36xbf16>, vector<36x286xbf16>, vector<8x286xf32> -> vector<8x286xf32>
    %c0_33 = arith.constant 0 : index
    %c0_34 = arith.constant 0 : index
    %30 = vector.load %arg3[%c0_33, %c0_34] : memref<8x1xf32, #tpu.memory_space<vmem>>, vector<8x1xf32>
    %31 = vector.broadcast %30 : vector<8x1xf32> to vector<8x286xf32>
    %32 = arith.addf %29, %31 : vector<8x286xf32>
    %cst_35 = arith.constant 0.000000e+00 : f32
    %33 = vector.broadcast %cst_35 : f32 to vector<8x286xf32>
    %34 = arith.maximumf %32, %33 : vector<8x286xf32>
    %35 = vector.extract_strided_slice %34 {offsets = [0, 0], sizes = [8, 285], strides = [1, 1]} : vector<8x286xf32> to vector<8x285xf32>
    %36 = vector.extract_strided_slice %34 {offsets = [0, 1], sizes = [8, 285], strides = [1, 1]} : vector<8x286xf32> to vector<8x285xf32>
    %37 = arith.maximumf %35, %36 : vector<8x285xf32>
    %38 = vector.extract_strided_slice %37 {offsets = [0, 0], sizes = [8, 267], strides = [1, 1]} : vector<8x285xf32> to vector<8x267xf32>
    %39 = vector.extract_strided_slice %37 {offsets = [0, 18], sizes = [8, 267], strides = [1, 1]} : vector<8x285xf32> to vector<8x267xf32>
    %40 = arith.maximumf %38, %39 : vector<8x267xf32>
    %41 = arith.truncf %40 : vector<8x267xf32> to vector<8x267xbf16>
    %c0_36 = arith.constant 0 : index
    %c0_37 = arith.constant 0 : index
    %42 = vector.load %arg8[%c0_36, %c0_37] : memref<267x1xbf16, #tpu.memory_space<vmem>>, vector<267x1xbf16>
    %cst_38 = arith.constant dense<0.000000e+00> : vector<8x1xf32>
    %43 = tpu.matmul %41, %42, %cst_38 {dimension_numbers = #tpu.dot_dimension_numbers<[1], [0], [0], [1], [0, 0, 1, 1], [], []>} : vector<8x267xbf16>, vector<267x1xbf16>, vector<8x1xf32> -> vector<8x1xf32>
    %c0_39 = arith.constant 0 : index
    %c0_40 = arith.constant 0 : index
    %44 = vector.load %arg4[%c0_39, %c0_40] : memref<32x8xf32, #tpu.memory_space<vmem>>, vector<32x8xf32>
    %cst_41 = arith.constant dense<0.000000e+00> : vector<32x1xf32>
    %45 = tpu.matmul %44, %43, %cst_41 {dimension_numbers = #tpu.dot_dimension_numbers<[1], [0], [0], [1], [0, 0, 1, 1], [], []>} : vector<32x8xf32>, vector<8x1xf32>, vector<32x1xf32> -> vector<32x1xf32>
    %c0_42 = arith.constant 0 : index
    %c0_43 = arith.constant 0 : index
    %46 = vector.load %arg5[%c0_42, %c0_43] : memref<32x1xf32, #tpu.memory_space<vmem>>, vector<32x1xf32>
    %47 = arith.addf %45, %46 : vector<32x1xf32>
    %cst_44 = arith.constant 0.000000e+00 : f32
    %48 = vector.broadcast %cst_44 : f32 to vector<32x1xf32>
    %49 = arith.maximumf %47, %48 : vector<32x1xf32>
    %c0_45 = arith.constant 0 : index
    %c0_46 = arith.constant 0 : index
    %50 = vector.load %arg6[%c0_45, %c0_46] : memref<10x32xf32, #tpu.memory_space<vmem>>, vector<10x32xf32>
    %cst_47 = arith.constant dense<0.000000e+00> : vector<10x1xf32>
    %51 = tpu.matmul %50, %49, %cst_47 {dimension_numbers = #tpu.dot_dimension_numbers<[1], [0], [0], [1], [0, 0, 1, 1], [], []>} : vector<10x32xf32>, vector<32x1xf32>, vector<10x1xf32> -> vector<10x1xf32>
    %c0_48 = arith.constant 0 : index
    %c0_49 = arith.constant 0 : index
    %52 = vector.load %arg7[%c0_48, %c0_49] : memref<10x1xf32, #tpu.memory_space<vmem>>, vector<10x1xf32>
    %53 = arith.addf %51, %52 : vector<10x1xf32>
    %c0_50 = arith.constant 0 : index
    %c0_51 = arith.constant 0 : index
    %c0_52 = arith.constant 0 : index
    %54 = vector.load %arg9[%c0_50, %c0_51, %c0_52] : memref<1x10x1xf32, #tpu.memory_space<vmem>>, vector<1x10x1xf32>
    %55 = vector.shape_cast %54 : vector<1x10x1xf32> to vector<10x1xf32>
    %56 = vector.shape_cast %53 : vector<10x1xf32> to vector<1x10x1xf32>
    tpu.vector_store %arg9[%c0_50, %c0_51, %c0_52], %56 {strides = array<i32>} : memref<1x10x1xf32, #tpu.memory_space<vmem>>, vector<1x10x1xf32>,
    return
  }
  func.func @transform_0(%arg0: i32) -> (i32, i32, i32) {
    %c0_i32 = arith.constant 0 : i32
    %c0_i32_0 = arith.constant 0 : i32
    %c0_i32_1 = arith.constant 0 : i32
    return %arg0, %c0_i32, %c0_i32_0 : i32, i32, i32
  }
  func.func @transform_1(%arg0: i32) -> (i32, i32) {
    %c0_i32 = arith.constant 0 : i32
    %c0_i32_0 = arith.constant 0 : i32
    %c0_i32_1 = arith.constant 0 : i32
    return %c0_i32, %c0_i32_0 : i32, i32
  }
  func.func @transform_2(%arg0: i32) -> (i32, i32) {
    %c0_i32 = arith.constant 0 : i32
    %c0_i32_0 = arith.constant 0 : i32
    %c0_i32_1 = arith.constant 0 : i32
    return %c0_i32, %c0_i32_0 : i32, i32
  }
  func.func @transform_3(%arg0: i32) -> (i32, i32) {
    %c0_i32 = arith.constant 0 : i32
    %c0_i32_0 = arith.constant 0 : i32
    %c0_i32_1 = arith.constant 0 : i32
    return %c0_i32, %c0_i32_0 : i32, i32
  }
  func.func @transform_4(%arg0: i32) -> (i32, i32) {
    %c0_i32 = arith.constant 0 : i32
    %c0_i32_0 = arith.constant 0 : i32
    %c0_i32_1 = arith.constant 0 : i32
    return %c0_i32, %c0_i32_0 : i32, i32
  }
  func.func @transform_5(%arg0: i32) -> (i32, i32) {
    %c0_i32 = arith.constant 0 : i32
    %c0_i32_0 = arith.constant 0 : i32
    %c0_i32_1 = arith.constant 0 : i32
    return %c0_i32, %c0_i32_0 : i32, i32
  }
  func.func @transform_6(%arg0: i32) -> (i32, i32) {
    %c0_i32 = arith.constant 0 : i32
    %c0_i32_0 = arith.constant 0 : i32
    %c0_i32_1 = arith.constant 0 : i32
    return %c0_i32, %c0_i32_0 : i32, i32
  }
  func.func @transform_7(%arg0: i32) -> (i32, i32) {
    %c0_i32 = arith.constant 0 : i32
    %c0_i32_0 = arith.constant 0 : i32
    %c0_i32_1 = arith.constant 0 : i32
    return %c0_i32, %c0_i32_0 : i32, i32
  }
  func.func @transform_8(%arg0: i32) -> (i32, i32, i32) {
    %c0_i32 = arith.constant 0 : i32
    %c0_i32_0 = arith.constant 0 : i32
    %c0_i32_1 = arith.constant 0 : i32
    return %arg0, %c0_i32, %c0_i32_0 : i32, i32, i32
  }
}

</mosaic_0001>

<bundles_post_ra>
// kernel: tpu_custom_call.1
= control target key start
LH: loop header
LB: loop body
LE: loop exit
PB: predicated region body
PF: predicated region fallthrough
CT: control target
= control target key end

     0   :  { %s1197_s27 = smov 0   ;;  %s1361_s0 = inlined_call_operand.vmem [shape: bf16[2,4,324], index: 0, kind: input, shape index: {}]   ;;  %s1362_s1 = inlined_call_operand.vmem [shape: bf16[8,36], index: 1, kind: input, shape index: {}]   ;;  %s1363_s2 = inlined_call_operand.vmem [shape: f32[8,1], index: 2, kind: input, shape index: {}]   ;;  %s1364_s3 = inlined_call_operand.vmem [shape: f32[32,8], index: 3, kind: input, shape index: {}]   ;;  %s1365_s4 = inlined_call_operand.vmem [shape: f32[32,1], index: 4, kind: input, shape index: {}]   ;;  %s1366_s5 = inlined_call_operand.vmem [shape: f32[10,32], index: 5, kind: input, shape index: {}]   ;;  %s1367_s6 = inlined_call_operand.vmem [shape: f32[10,1], index: 6, kind: input, shape index: {}]   ;;  %s1368_s7 = inlined_call_operand.vmem [shape: bf16[267,1], index: 7, kind: input, shape index: {}]   ;;  %s1369_s8 = inlined_call_operand.vmem [shape: f32[2,10,1], index: 8, kind: output, shape index: {}]  }
   0x1 LB: > { %s967_s28 = sadd.s32 4294967295, %s1140_s27   ;;  %p971_p0 = scmp.ge.s32.totalorder %s1140_s27, 1  ;;  %s1140_s27 = sphi %s1197_s27, %s18_s27  }
   0x2   : > { %p262_p1 = scmp.lt.s32.totalorder %s1140_s27, 3 }
   0x4   : > { %p263_p2 = pnand %p971_p0, %p262_p1 }
   0x5   : > { %p296_p3 = scmp.lt.s32.totalorder (!%p263_p2), %s967_s28, 1  ;;  %s1142_s11 = smov (!%p263_p2), 127  }
   0x6   : > { %266 = sbr.rel (%p263_p2) target bundleno = 1052 (0x41c), region = 52  ;;  %s1143_s12 = smov (!%p263_p2), 126  }
   0x7   : > { %s1144_s13 = smov (!%p263_p2), 109   ;;  %s1145_s14 = smov (!%p263_p2), 108  }
   0x8   : > { %s1146_s15 = smov (!%p263_p2), 92   ;;  %s1147_s16 = smov (!%p263_p2), 91  }
   0x9   : > { %s1148_s17 = smov (!%p263_p2), 90   ;;  %s1149_s18 = smov (!%p263_p2), 110  }
   0xb   : > { %s1371_s28 = smov (!%p296_p3, %s967_s28), 1  ;;  %vm315_vm0 = vcmask 238592   ;;  %vm338_vm1 = vcmask 240642   ;;  %vm331_vm2 = vcmask 1043456   ;;  %vm395_vm3 = vcmask 891904  }
   0xc   : > { %s1103_s29 = smul.u32 6, %s1371_s28  ;;  %vm436_vm4 = vcmask 752640   ;;  %vm416_vm5 = vcmask 883712   ;;  %vm354_vm6 = vcmask 1031168   ;;  %vm457_vm7 = vcmask 744448   ;;  %s1079_s19 = sshll.u32 %s1371_s28, 4 }
   0xd   : > { %vm333_vm8 = vcmask 1039360   ;;  %vm477_vm9 = vcmask 736256   ;;  %vm544_vm10 = vcmask 1041408   ;;  %vm375_vm11 = vcmask 900096   ;;  %s305_s24 = scalar_lea.vmem %s1369_s8, %s1079_s19 }
   0xe   : > { %s1211_s10 = scalar_lea.vmem %s1361_s0, %s1103_s29  ;;  %vm540_vm12 = vcmask 293888   ;;  %vm774_vm13 = vcmask 1044480   ;;  %vm775_vm14 = vcmask 1045504   ;;  %vm770_vm15 = vcmask 89088  }
   0xf   : > { %v307_v0 = vld [vmem:[%s1211_s10] sm:$0x3f] }
  0x10   : > { %309 = vst [vmem:[#allocation1] ss:$2 sm:$0xff] %v307_v0  ;;  %v317_v1 = vld [vmem:[%s1211_s10] sm:$0x3f] }
  0x11   : > { %v340_v4 = vld [vmem:[%s1211_s10] sm:$0x3f] }
  0x12   : > { %v360_v7 = vld [vmem:[%s1211_s10] sm:$0x3f] }
  0x13   : > { %v381_v10 = vld [vmem:[%s1211_s10] sm:$0x3f] }
  0x14   : > { %v401_v13 = vld [vmem:[%s1211_s10] sm:$0x3f] }
  0x15   : > { %v422_v16 = vld [vmem:[%s1211_s10] sm:$0x3f] }
  0x16   : > { %v442_v19 = vld [vmem:[%s1211_s10] sm:$0x3f] }
  0x17   : > { %v310_v2 = vld.sshfl [vmem:[#allocation1] sm:$0xff pattern:$0x75643120]  ;;  %v311_v3 = vld.sshfl [vmem:[#allocation1 + $0x8] sm:$0xff pattern:$0x75643120] }
  0x18   : > { %320 = vst [vmem:[#allocation1 + $0x1] ss:$2 sm:$0xff] %v317_v1  ;;  %v463_v22 = vld [vmem:[%s1211_s10] sm:$0x3f] }
  0x19   : > { %314 = vst [vmem:[#allocation2] sm:$0x33] %v310_v2 }
  0x1a   : > { %316 = vst.msk [vmem:[#allocation2 + $0x8] sm:$0x3] %vm315_vm0, %v311_v3 }
  0x1f   : > { %v323_v5 = vld.sshfl [vmem:[#allocation1 + $0x8] sm:$0xff pattern:$0x75643120]  ;;  %v321_v6 = vld.sshfl [vmem:[#allocation1] sm:$0xff pattern:$0x75643120] }
  0x20   : > { %327 = vrot.lane.b32.xlu1 %v323_v5, %s1142_s11  ;;  %342 = vst [vmem:[#allocation1] ss:$2 sm:$0xff] %v340_v4  ;;  %v494_v5 = vld [vmem:[%s1363_s2] sm:$0xff] }
  0x27   : > { %v343_v8 = vld.sshfl [vmem:[#allocation1] sm:$0xff pattern:$0x75643120]  ;;  %v345_v9 = vld.sshfl [vmem:[#allocation1 + $0x8] sm:$0xff pattern:$0x75643120] }
  0x28   : > { %363 = vst [vmem:[#allocation1 + $0x1] ss:$2 sm:$0xff] %v360_v7  ;;  %349 = vrot.lane.b32.xlu2 %v345_v9, %s1143_s12 }
  0x2f   : > { %v364_v11 = vld.sshfl [vmem:[#allocation1] sm:$0xff pattern:$0x75643120]  ;;  %v366_v12 = vld.sshfl [vmem:[#allocation1 + $0x8] sm:$0xff pattern:$0x75643120] }
  0x30   : > { %383 = vst [vmem:[#allocation1] ss:$2 sm:$0xff] %v381_v10 }
  0x37   : > { %v386_v14 = vld.sshfl [vmem:[#allocation1 + $0x8] sm:$0xff pattern:$0x75643120]  ;;  %v384_v15 = vld.sshfl [vmem:[#allocation1] sm:$0xff pattern:$0x75643120] }
  0x38   : > { %390 = vrot.lane.b32.xlu1 %v386_v14, %s1144_s13  ;;  %404 = vst [vmem:[#allocation1 + $0x1] ss:$2 sm:$0xff] %v401_v13  ;;  %388 = vrot.lane.b32.xlu0 %v384_v15, %s1144_s13 }
  0x3f   : > { %v407_v17 = vld.sshfl [vmem:[#allocation1 + $0x8] sm:$0xff pattern:$0x75643120]  ;;  %v405_v18 = vld.sshfl [vmem:[#allocation1] sm:$0xff pattern:$0x75643120] }
  0x40   : > { %411 = vrot.lane.b32.xlu1 %v407_v17, %s1145_s14  ;;  %424 = vst [vmem:[#allocation1] ss:$2 sm:$0xff] %v422_v16 }
  0x47   : > { %v427_v20 = vld.sshfl [vmem:[#allocation1 + $0x8] sm:$0xff pattern:$0x75643120]  ;;  %v425_v21 = vld.sshfl [vmem:[#allocation1] sm:$0xff pattern:$0x75643120] }
  0x48   : > { %409 = vrot.lane.b32.xlu1 %v405_v18, %s1145_s14  ;;  %431 = vrot.lane.b32.xlu2 %v427_v20, %s1146_s15  ;;  %445 = vst [vmem:[#allocation1 + $0x1] ss:$2 sm:$0xff] %v442_v19 }
  0x4f   : > { %v446_v23 = vld.sshfl [vmem:[#allocation1] sm:$0xff pattern:$0x75643120]  ;;  %v448_v24 = vld.sshfl [vmem:[#allocation1 + $0x8] sm:$0xff pattern:$0x75643120] }
  0x50   : > { %450 = vrot.lane.b32.xlu0 %v446_v23, %s1147_s16  ;;  %465 = vst [vmem:[#allocation1] ss:$2 sm:$0xff] %v463_v22  ;;  %325 = vrot.lane.b32.xlu1 %v321_v6, %s1142_s11 }
  0x51   : > { %429 = vrot.lane.b32.xlu2 %v425_v21, %s1146_s15 }
  0x57   : > { %v468_v25 = vld.sshfl [vmem:[#allocation1 + $0x8] sm:$0xff pattern:$0x75643120]  ;;  %v466_v26 = vld.sshfl [vmem:[#allocation1] sm:$0xff pattern:$0x75643120] }
  0x58   : > { %472 = vrot.lane.b32.xlu0 %v468_v25, %s1148_s17 }
  0x59   : > { %452 = vrot.lane.b32.xlu2 %v448_v24, %s1147_s16 }
  0x60   : > { %470 = vrot.lane.b32.xlu0 %v466_v26, %s1148_s17 }
  0x61   : > { %347 = vrot.lane.b32.xlu2 %v343_v8, %s1143_s12  ;;  %v1150_v8 = vmov 0  }
  0x62   : > { %1122 = vset.pattern.permute.xlu1 %v1150_v8  ;;  %1133 = vset.pattern.permute.xlu0 %v1150_v8 }
  0x63   : > { %497 = vperm.xlu1 %1122, %v494_v5  }
  0x68   : > { %370 = vrot.lane.b32.xlu0 %v366_v12, %s1149_s18 }
  0x70   : > { %368 = vrot.lane.b32.xlu0 %v364_v11, %s1149_s18 }
  0x82   : > { %v350_v27 = vpop.permute.xlu2 %349 }
  0x83   : > { %359 = vst.msk [vmem:[#allocation2 + $0x14] sm:$0x3] %vm315_vm0, %v350_v27  ;;  %v352_v44 = vrot.slane %v350_v27, 4 }
  0x92   : > { %v328_v28 = vpop.permute.xlu1 %327 }
  0x93   : > { %339 = vst.msk [vmem:[#allocation2 + $0x8] sm:$0xc] %vm338_vm1, %v328_v28  ;;  %v330_v53 = vrot.slane %v328_v28, 4 }
  0x9a   : > { %v985_v20 = vld [vmem:[#allocation2 + $0x8] sm:$0xf] }
  0xa2   : > { %v432_v29 = vpop.permute.xlu2 %431 }
  0xa3   : > { %441 = vst.msk [vmem:[#allocation2 + $0x2c] sm:$0x3] %vm315_vm0, %v432_v29  ;;  %v434_v30 = vrot.slane %v432_v29, 4 }
  0xaa   : > { %v391_v31 = vpop.permute.xlu1 %390  ;;  %v389_v32 = vpop.permute.xlu0 %388 }
  0xab   : > { %v393_v33 = vrot.slane %v391_v31, 4  ;;  %400 = vst.msk [vmem:[#allocation2 + $0x20] sm:$0x3] %vm315_vm0, %v391_v31  ;;  %v430_v34 = vpop.permute.xlu2 %429  ;;  %v392_v35 = vrot.slane %v389_v32, 4 }
  0xac   : > { %v433_v36 = vrot.slane %v430_v34, 4 }
  0xad   : > { %v394_v37 = vsel %vm331_vm2, %v392_v35, %v393_v33 }
  0xae   : > { %v435_v38 = vsel %vm331_vm2, %v433_v36, %v434_v30  ;;  %v396_v39 = vsel %vm395_vm3, %v389_v32, %v394_v37  ;;  %v483_v36 = vld [vmem:[%s1362_s1] sm:$0xf]  ;;  %vm910_vm3 = vcmask 1024  }
  0xaf   : > { %v437_v40 = vsel %vm436_vm4, %v430_v34, %v435_v38  ;;  %399 = vst [vmem:[#allocation2 + $0x18] sm:$0x33] %v396_v39 }
  0xb0   : > { %440 = vst [vmem:[#allocation2 + $0x24] sm:$0x33] %v437_v40 }
  0xb2   : > { %v412_v41 = vpop.permute.xlu1 %411 }
  0xb3   : > { %421 = vst.msk [vmem:[#allocation2 + $0x20] sm:$0xc] %vm338_vm1, %v412_v41  ;;  %v453_v42 = vpop.permute.xlu2 %452  ;;  %v414_v43 = vrot.slane %v412_v41, 4 }
  0xb4   : > { %462 = vst.msk [vmem:[#allocation2 + $0x2c] sm:$0xc] %vm338_vm1, %v453_v42  ;;  %v455_v54 = vrot.slane %v453_v42, 4 }
  0xba   : > { %v410_v45 = vpop.permute.xlu1 %409  ;;  %v997_v10 = vld [vmem:[#allocation2 + $0x20] sm:$0xf] }
  0xbb   : > { %v413_v46 = vrot.slane %v410_v45, 4  ;;  %v348_v47 = vpop.permute.xlu2 %347  ;;  %v1085_v12 = vld [vmem:[#allocation2 + $0x28] sm:$0xf0] }
  0xbc   : > { %v351_v48 = vrot.slane %v348_v47, 4  ;;  %v998_v14 = vor.u32 %v1085_v12, %v997_v10  ;;  %v1093_v10 = vld [vmem:[%s1368_s7 + $0x38] sm:$0xff]  ;;  %v1092_v12 = vld [vmem:[%s1368_s7 + $0x30] sm:$0xff] }
  0xbd   : > { %v415_v49 = vsel %vm331_vm2, %v413_v46, %v414_v43  ;;  %781 = vmatpush.bf16.msra.mxu3 %v1093_v10 }
  0xbe   : > { %v417_v50 = vsel %vm416_vm5, %v410_v45, %v415_v49  ;;  %v353_v51 = vsel %vm331_vm2, %v351_v48, %v352_v44 }
  0xbf   : > { %420 = vst [vmem:[#allocation2 + $0x18] sm:$0xcc] %v417_v50  ;;  %v355_v52 = vsel %vm354_vm6, %v348_v47, %v353_v51 }
  0xc0   : > { %358 = vst [vmem:[#allocation2 + $0xc] sm:$0x33] %v355_v52 }
  0xc1   : > { %782 = vmatpush.bf16.msra.mxu3 %v1092_v12 }
  0xc2   : > { %v451_v55 = vpop.permute.xlu0 %450  ;;  %v326_v56 = vpop.permute.xlu1 %325 }
  0xc3   : > { %v454_v57 = vrot.slane %v451_v55, 4  ;;  %v329_v58 = vrot.slane %v326_v56, 4 }
  0xc5   : > { %v456_v59 = vsel %vm331_vm2, %v454_v57, %v455_v54  ;;  %v332_v60 = vsel %vm331_vm2, %v329_v58, %v330_v53 }
  0xc6   : > { %v458_v61 = vsel %vm457_vm7, %v451_v55, %v456_v59  ;;  %v334_v62 = vsel %vm333_vm8, %v326_v56, %v332_v60  ;;  %v989_v31 = vld [vmem:[#allocation2 + $0x18] sm:$0xf]  ;;  %v1083_v32 = vld [vmem:[#allocation2 + $0x1c] sm:$0xf] }
  0xc7   : > { %461 = vst [vmem:[#allocation2 + $0x24] sm:$0xcc] %v458_v61 }
  0xc8   : > { %337 = vst [vmem:[#allocation2] sm:$0xcc] %v334_v62 }
  0xca   : > { %v473_v63 = vpop.permute.xlu0 %472 }
  0xcb   : > { %482 = vst.msk [vmem:[#allocation2 + $0x38] sm:$0x3] %vm315_vm0, %v473_v63  ;;  %v475_v2 = vrot.slane %v473_v63, 4  ;;  %vm828_vm0 = vcmask 64512  }
  0xce   : > { %v1084_v24 = vld [vmem:[#allocation2 + $0x20] sm:$0xf0]  ;;  %v991_v29 = vld [vmem:[#allocation2 + $0x24] sm:$0xf0] }
  0xcf   : > { %v990_v34 = vor.u32 %v1084_v24, %v989_v31  ;;  %v994_v35 = vor.u32 %v1083_v32, %v991_v29  ;;  %v977_v37 = vld [vmem:[#allocation2] sm:$0xf]  ;;  %v1080_v39 = vld [vmem:[#allocation2 + $0x4] sm:$0xf]  ;;  %v1086_v24 = vld [vmem:[%s1368_s7] sm:$0xff] }
  0xd2   : > { %v471_v0 = vpop.permute.xlu0 %470  ;;  %v493_v1 = vld [vmem:[#allocation2 + $0x38] sm:$0x3] }
  0xd3   : > { %v474_v3 = vrot.slane %v471_v0, 4  ;;  %v524_v4 = vunpack.c.l.b16 %v493_v1 }
  0xd5   : > { %v476_v6 = vsel %vm331_vm2, %v474_v3, %v475_v2  ;;  %v533_v7 = vpack.c.b16 %v524_v4, %v524_v4  ;;  %v498_v43 = vpop.permute.xlu1 %497  ;;  %v1068_v3 = vld [vmem:[%s1368_s7 + $0x80] sm:$0xf]  ;;  %v1102_v4 = vld [vmem:[%s1368_s7 + $0x80] sm:$0x30] }
  0xd6   : > { %v478_v9 = vsel %vm477_vm9, %v471_v0, %v476_v6  ;;  %v1069_v5 = vor.u32 %v1102_v4, %v1068_v3  ;;  %v1151_v6 = vmov 65535   ;;  %v875_v3 = vld [vmem:[%s1366_s5 + $0x8] sm:$0x3]  ;;  %v876_v4 = vld [vmem:[%s1367_s6] sm:$0xff] }
  0xd7   : > { %481 = vst [vmem:[#allocation2 + $0x30] sm:$0x33] %v478_v9  ;;  %v552_v11 = vsel %vm544_vm10, %v533_v7, 0  ;;  %v776_v7 = vsel %vm774_vm13, 4294967295, %v1151_v6 }
  0xd8   : > { %585 = vmatpush.bf16.msra.mxu2 %v552_v11  ;;  %v777_v8 = vsel %vm775_vm14, %v776_v7, 0  ;;  %v1101_v11 = vld [vmem:[%s1368_s7 + $0x78] sm:$0xff]  ;;  %v877_v7 = vld [vmem:[%s1367_s6 + $0x8] sm:$0x3] }
  0xd9   : > { %v779_v9 = vand.u32 %v1069_v5, %v777_v8 }
  0xda   : > { %v371_v13 = vpop.permute.xlu0 %370 }
  0xdb   : > { %380 = vst.msk [vmem:[#allocation2 + $0x14] sm:$0xc] %vm338_vm1, %v371_v13  ;;  %v373_v21 = vrot.slane %v371_v13, 4  ;;  %v1100_v13 = vld [vmem:[%s1368_s7 + $0x70] sm:$0xff]  ;;  %vm878_vm1 = vcmask 261120  }
  0xdc   : > { %586 = vmatpush.bf16.msra.mxu2 %v998_v14  ;;  %v1091_v14 = vld [vmem:[%s1368_s7 + $0x28] sm:$0xff] }
  0xdd   : > { %783 = vmatpush.bf16.msra.mxu3 %v1091_v14 }
  0xde   : > { %v492_v15 = vld [vmem:[#allocation2 + $0x30] sm:$0x33] }
  0xdf   : > { %v522_v16 = vunpack.c.l.b16 %v492_v15  ;;  %v523_v17 = vunpack.c.h.b16 %v492_v15  ;;  %v1099_v15 = vld [vmem:[%s1368_s7 + $0x68] sm:$0xff] }
  0xe1   : > { %v531_v18 = vpack.c.b16 %v522_v16, %v522_v16  ;;  %v532_v19 = vpack.c.b16 %v523_v17, %v523_v17  ;;  %v1090_v16 = vld [vmem:[%s1368_s7 + $0x20] sm:$0xff] }
  0xe2   : > { %v369_v22 = vpop.permute.xlu0 %368  ;;  %v1082_v23 = vld [vmem:[#allocation2 + $0x10] sm:$0xf0]  ;;  %v1098_v17 = vld [vmem:[%s1368_s7 + $0x60] sm:$0xff]  ;;  %784 = vmatpush.bf16.msra.mxu3 %v1090_v16 }
  0xe3   : > { %v372_v25 = vrot.slane %v369_v22, 4  ;;  %v546_v26 = vsel %vm544_vm10, %v531_v18, 0  ;;  %v549_v27 = vsel %vm544_vm10, %v532_v19, 0  ;;  %v986_v28 = vor.u32 %v1082_v23, %v985_v20  ;;  %v1089_v18 = vld [vmem:[%s1368_s7 + $0x18] sm:$0xff]  ;;  %v1088_v20 = vld [vmem:[%s1368_s7 + $0x10] sm:$0xff]  ;;  %v1095_v23 = vld [vmem:[%s1368_s7 + $0x48] sm:$0xff] }
  0xe4   : > { %559 = vmatpush.bf16.msra.mxu0 %v546_v26  ;;  %572 = vmatpush.bf16.msra.mxu1 %v549_v27  ;;  %v1097_v19 = vld [vmem:[%s1368_s7 + $0x58] sm:$0xff] }
  0xe5   : > { %v374_v30 = vsel %vm331_vm2, %v372_v25, %v373_v21  ;;  %587 = vmatpush.bf16.msra.mxu2 %v986_v28  ;;  %v1096_v21 = vld [vmem:[%s1368_s7 + $0x50] sm:$0xff]  ;;  %v1094_v25 = vld [vmem:[%s1368_s7 + $0x40] sm:$0xff]  ;;  %vm908_vm2 = vcmask 7168  }
  0xe6   : > { %v376_v33 = vsel %vm375_vm11, %v369_v22, %v374_v30  ;;  %785 = vmatpush.bf16.msra.mxu3 %v1089_v18  ;;  %v1087_v22 = vld [vmem:[%s1368_s7 + $0x8] sm:$0xff] }
  0xe7   : > { %379 = vst [vmem:[#allocation2 + $0xc] sm:$0xcc] %v376_v33 }
  0xe8   : > { %560 = vmatpush.bf16.msra.mxu0 %v990_v34  ;;  %573 = vmatpush.bf16.msra.mxu1 %v994_v35 }
  0xe9   : > { %1001 = vmatmul.msk.bf16.vlgmr.msra.gmra.mxu2 %vm540_vm12, %v483_v36 }
  0xea   : > { %786 = vmatpush.bf16.msra.mxu3 %v1088_v20 }
  0xee   : > { %v1081_v38 = vld [vmem:[#allocation2 + $0x8] sm:$0xf0]  ;;  %v979_v40 = vld [vmem:[#allocation2 + $0xc] sm:$0xf0]  ;;  %787 = vmatpush.bf16.msra.mxu3 %v1087_v22 }
  0xef   : > { %v978_v41 = vor.u32 %v1081_v38, %v977_v37  ;;  %v982_v42 = vor.u32 %v1080_v39, %v979_v40 }
  0xf1   : > { %561 = vmatpush.bf16.msra.mxu0 %v978_v41  ;;  %574 = vmatpush.bf16.msra.mxu1 %v982_v42 }
  0xf2   : > { %788 = vmatpush.bf16.msra.mxu3 %v1086_v24 }
  0xf4   : > { %999 = vmatmul.msk.bf16.vlgmr.msra.gmra.mxu0 %vm540_vm12, %v483_v36  ;;  %1000 = vmatmul.msk.bf16.vlgmr.msra.gmra.mxu1 %vm540_vm12, %v483_v36 }
  0xf5   : > { %814 = vmatpush.bf16.msrb.mxu1 %v779_v9  ;;  %794 = vmatpush.bf16.msrb.mxu0 %v1101_v11 }
  0xf9   : > { %795 = vmatpush.bf16.msrb.mxu0 %v1100_v13 }
  0xfd   : > { %796 = vmatpush.bf16.msrb.mxu0 %v1099_v15 }
 0x101   : > { %797 = vmatpush.bf16.msrb.mxu0 %v1098_v17 }
 0x105   : > { %798 = vmatpush.bf16.msrb.mxu0 %v1097_v19 }
 0x109   : > { %799 = vmatpush.bf16.msrb.mxu0 %v1096_v21 }
 0x10d   : > { %800 = vmatpush.bf16.msrb.mxu0 %v1095_v23 }
 0x111   : > { %801 = vmatpush.bf16.msrb.mxu0 %v1094_v25 }
 0x16c   : > { %v589_v44 = vpop.f32.mrf.mxu2 }
 0x16d   : > { %v590_v45 = vadd.f32 %v589_v44, %v498_v43 }
 0x16f   : > { %v595_v46 = vmax.f32 %v590_v45, 0.0  ;;  %v820_v45 = vld [vmem:[%s1364_s3] sm:$0xff] }
 0x171   : > { %603 = vrot.lane.b32.xlu0 %v595_v46, %s1142_s11  ;;  %v563_v47 = vpop.f32.mrf.mxu0  ;;  %v576_v48 = vpop.f32.mrf.mxu1 }
 0x172   : > { %v564_v49 = vadd.f32 %v563_v47, %v498_v43  ;;  %v577_v50 = vadd.f32 %v576_v48, %v498_v43  ;;  %v821_v47 = vld [vmem:[%s1364_s3 + $0x8] sm:$0xff]  ;;  %v822_v48 = vld [vmem:[%s1364_s3 + $0x10] sm:$0xff] }
 0x174   : > { %v593_v51 = vmax.f32 %v564_v49, 0.0  ;;  %v594_v52 = vmax.f32 %v577_v50, 0.0  ;;  %v591_v53 = vpop.f32.mrf.mxu2  ;;  %v823_v49 = vld [vmem:[%s1364_s3 + $0x18] sm:$0xff] }
 0x175   : > { %v826_v53 = vld [vmem:[%s1365_s4 + $0x10] sm:$0xff] }
 0x176   : > { %v1123_v54 = vpack.i.bf16 %v594_v52, %v593_v51 }
 0x178   : > { %1124 = vrot.lane.b32.xlu2 %v1123_v54, %s1142_s11  ;;  %v827_v54 = vld [vmem:[%s1365_s4 + $0x18] sm:$0xff] }
 0x179   : > { %v565_v55 = vpop.f32.mrf.mxu0  ;;  %v578_v56 = vpop.f32.mrf.mxu1 }
 0x17a   : > { %v825_v55 = vld [vmem:[%s1365_s4 + $0x8] sm:$0xff] }
 0x1d2   : > { %v1125_v57 = vpop.permute.xlu2 %1124 }
 0x1d3   : > { %v1127_v58 = vunpack.i.h.bf16 %v1125_v57  ;;  %v1126_v59 = vunpack.i.l.bf16 %v1125_v57 }
 0x1d5   : > { %v606_v60 = vsel %vm333_vm8, %v1126_v59, %v1127_v58  ;;  %v824_v59 = vld [vmem:[%s1365_s4] sm:$0xff] }
 0x1d6   : > { %v611_v1 = vmax.f32 %v593_v51, %v606_v60 }
 0x1e3   : > { %v604_v61 = vpop.permute.xlu0 %603 }
 0x1e4   : > { %v607_v62 = vsel %vm333_vm8, %v1127_v58, %v604_v61  ;;  %v613_v63 = vmax.f32 %v595_v46, %v604_v61 }
 0x1e5   : > { %v612_v0 = vmax.f32 %v594_v52, %v607_v62 }
 0x1e6   : > { %621 = vrot.lane.b32.xlu2 %v613_v63, %s1149_s18 }
 0x1e7   : > { %v1128_v2 = vpack.i.bf16 %v612_v0, %v611_v1 }
 0x1e9   : > { %1129 = vrot.lane.b32.xlu1 %v1128_v2, %s1149_s18  ;;  %v874_v2 = vld [vmem:[%s1366_s5] sm:$0xff] }
 0x240   : > { %v622_v26 = vpop.permute.xlu2 %621 }
 0x241   : > { %v631_v27 = vmax.f32 %v613_v63, %v622_v26 }
 0x243   : > { %v634_v28 = vpack.c.bf16 %v631_v27, %v631_v27 }
 0x245   : > { %1070 = vmatmul.msk.bf16.vlgmr.msrb.gmra.mxu1 %vm770_vm15, %v634_v28 }
 0x25b   : > { %v1130_v29 = vpop.permute.xlu1 %1129 }
 0x25c   : > { %v1132_v30 = vunpack.i.h.bf16 %v1130_v29  ;;  %v1131_v31 = vunpack.i.l.bf16 %v1130_v29 }
 0x25e   : > { %v625_v32 = vsel %vm375_vm11, %v1132_v30, %v622_v26  ;;  %v624_v33 = vsel %vm375_vm11, %v1131_v31, %v1132_v30 }
 0x25f   : > { %v629_v34 = vmax.f32 %v611_v1, %v624_v33  ;;  %v630_v35 = vmax.f32 %v612_v0, %v625_v32 }
 0x261   : > { %v632_v36 = vpack.c.bf16 %v629_v34, %v629_v34  ;;  %v633_v37 = vpack.c.bf16 %v630_v35, %v630_v35 }
 0x263   : > { %789 = vmatmul.bf16.vlgmr.msra.gmra.mxu3 %v632_v36  ;;  %802 = vmatmul.bf16.vlgmr.msrb.gmra.mxu0 %v633_v37 }
 0x2c2   : > { %v816_v38 = vpop.f32.mrf.mxu1 }
 0x2ca   : > { %v818_v39 = vpop.f32.mrf.mxu1 }
 0x2e0   : > { %v803_v40 = vpop.f32.mrf.mxu0 }
 0x2e6   : > { %v790_v41 = vpop.f32.mrf.mxu3 }
 0x2e7   : > { %v804_v42 = vadd.f32 %v803_v40, %v790_v41 }
 0x2e8   : > { %v805_v43 = vpop.f32.mrf.mxu0 }
 0x2e9   : > { %v817_v44 = vadd.f32 %v816_v38, %v804_v42 }
 0x2eb   : > { %856 = vmatpush.msrb.mxu2 %v817_v44 }
 0x2ec   : > { %1071 = vmatmul.msk.f32.vlgmr.msrb.gmra.mxu2 %vm828_vm0, %v820_v45 }
 0x2ee   : > { %v792_v46 = vpop.f32.mrf.mxu3 }
 0x2f4   : > { %1072 = vmatmul.msk.f32.gmra.mxu2 %vm828_vm0, %v821_v47 }
 0x2fc   : > { %1073 = vmatmul.msk.f32.gmra.mxu2 %vm828_vm0, %v822_v48 }
 0x304   : > { %1074 = vmatmul.msk.f32.gmra.mxu2 %vm828_vm0, %v823_v49 }
 0x36f   : > { %v858_v50 = vpop.f32.mrf.mxu2 }
 0x370   : > { %v859_v62 = vadd.f32 %v858_v50, %v824_v59 }
 0x372   : > { %v870_v1 = vmax.f32 %v859_v62, 0.0 }
 0x377   : > { %v861_v51 = vpop.f32.mrf.mxu2 }
 0x378   : > { %v862_v60 = vadd.f32 %v861_v51, %v825_v55 }
 0x37a   : > { %v871_v0 = vmax.f32 %v862_v60, 0.0 }
 0x37f   : > { %v864_v52 = vpop.f32.mrf.mxu2 }
 0x380   : > { %v865_v57 = vadd.f32 %v864_v52, %v826_v53 }
 0x382   : > { %v872_v63 = vmax.f32 %v865_v57, 0.0 }
 0x387   : > { %v867_v56 = vpop.f32.mrf.mxu2 }
 0x388   : > { %v868_v58 = vadd.f32 %v867_v56, %v827_v54 }
 0x38a   : > { %v873_v61 = vmax.f32 %v868_v58, 0.0 }
 0x38c   : > { %897 = vmatpush.msra.mxu1 %v873_v61 }
 0x38e   : > { %898 = vmatpush.msra.mxu1 %v872_v63 }
 0x390   : > { %899 = vmatpush.msra.mxu1 %v871_v0 }
 0x392   : > { %900 = vmatpush.msra.mxu1 %v870_v1 }
 0x393   : > { %1075 = vmatmul.msk.f32.vlgmr.msra.gmra.mxu1 %vm878_vm1, %v874_v2 }
 0x39b   : > { %1076 = vmatmul.msk.f32.gmra.mxu1 %vm878_vm1, %v875_v3 }
 0x410   : > { %v902_v5 = vpop.f32.mrf.mxu1 }
 0x411   : > { %v903_v6 = vadd.f32 %v902_v5, %v876_v4 }
 0x413   : > { %909 = vst.msk [vmem:[%s305_s24] sm:$0xff] %vm908_vm2, %v903_v6 }
 0x418   : > { %v905_v8 = vpop.f32.mrf.mxu1 }
 0x419   : > { %v906_v9 = vadd.f32 %v905_v8, %v877_v7 }
 0x41b   : > { %911 = vst.msk [vmem:[%s305_s24 + $0x8] sm:$0x3] %vm910_vm3, %v906_v9 }
 0x41c PF: > { %s18_s27 = sadd.s32 1, %s1140_s27  }
 0x41d   : > { %p15_p4 = scmp.ge.s32.totalorder %s18_s27, 4  }
 0x41f   :  { %17 = sbr.rel (!%p15_p4) target bundleno = 1 (0x1), region = 86 }

</bundles_post_ra>
